<compile_context>
chip_gen: v7x
topology: tpu7x:2x2x1
jax: 0.10.0
libtpu: 0.0.40
codegen_flags: <defaults>
</compile_context>

<pallas_src>
import functools

import jax
import jax.numpy as jnp
from jax.experimental import pallas as pl
from jax.experimental.pallas import tpu as pltpu

MONSTER_SIZE = 10
GOAL_SIZE = 6
D_IN = GOAL_SIZE + 2 * MONSTER_SIZE   # 26
D_IN_PAD = 32                         # padded K for the fused layer-1 matmul
HIDDEN = 32
OUT = 2


def onehotq_kernel(goal_ref, m1_ref, m2_ref,
                   w1t_ref, b1_ref, w2t_ref, b2_ref, w3t_ref, b3_ref,
                   out_ref):
    bt = out_ref.shape[1]

    # Index rows are (1, Bt); concat offsets applied here (cheap VALU adds),
    # not in a separate wrapper-side XLA pass.
    g = goal_ref[...]                                       # goal  -> [0, 6)
    a = m1_ref[...] + GOAL_SIZE                             # m1    -> [6, 16)
    b = m2_ref[...] + (GOAL_SIZE + MONSTER_SIZE)            # m2    -> [16, 26)

    # Fused one-hot concat: X[f, batch] = 1 iff any of the 3 offset indices
    # equals f.  In-range indices never collide and pad rows 26..31 never
    # match, so this is exactly concat(one_hot, one_hot, one_hot).
    f_iota = jax.lax.broadcasted_iota(jnp.int32, (D_IN_PAD, bt), 0)
    x = ((f_iota == g) | (f_iota == a) | (f_iota == b)).astype(jnp.float32)

    # Layer 1: single K=32 matmul (pad columns of W1^T are zero).
    h = jnp.dot(w1t_ref[...], x, preferred_element_type=jnp.float32) + b1_ref[...]
    h = jnp.maximum(h, 0.0)

    # Layer 2.
    h = jnp.dot(w2t_ref[...], h, preferred_element_type=jnp.float32) + b2_ref[...]
    h = jnp.maximum(h, 0.0)

    # Layer 3 -> (2, Bt); lane-dense store (masked only on the ragged tail).
    out_ref[...] = (jnp.dot(w3t_ref[...], h, preferred_element_type=jnp.float32)
                    + b3_ref[...])


def _round_up(x, m):
    return ((x + m - 1) // m) * m


def _cdiv(a, b):
    return (a + b - 1) // b


@functools.partial(jax.jit, static_argnames=("b_tile", "batch_major"))
def one_hot_q_forward(goal_idx, m1_idx, m2_idx, params, *,
                      b_tile=None, batch_major=True):
    """OneHotQ forward.

    Returns (B, 2) f32 when batch_major=True (module semantics), or the
    lane-dense (2, B) slab when batch_major=False (skips an XLA transpose).
    Indices are assumed in-range (torch's F.one_hot would raise otherwise).
    """
    B = goal_idx.shape[0]

    if b_tile is None:
        # Large tiles amortize the ~0.35us/step pipeline overhead; keep ~8
        # grid steps for big batches so the "parallel" axis can shard across
        # v7x's two TensorCores.  Cap at 4096 lanes (<3 MiB VMEM per step).
        b_tile = min(4096, _round_up(_cdiv(B, 8), 128))
    else:
        b_tile = _round_up(max(int(b_tile), 1), 128)
    b_tile = max(128, b_tile)

    # Ragged last block: Pallas reads garbage past B (harmless, those output
    # lanes are never written back) and drops OOB output writes, so no
    # wrapper-side padding pass is needed.
    grid = (_cdiv(B, b_tile),)

    # Free (metadata-only) views: (B,) -> (1, B) int32 rows.
    g_row = goal_idx.astype(jnp.int32).reshape(1, B)
    m1_row = m1_idx.astype(jnp.int32).reshape(1, B)
    m2_row = m2_idx.astype(jnp.int32).reshape(1, B)

    # Pre-transpose weights for the batch-on-lanes layout; zero-pad W1^T
    # from 26 to 32 columns so layer 1 is one matmul.  (~10 KiB total.)
    w1t = jnp.zeros((HIDDEN, D_IN_PAD), jnp.float32).at[:, :D_IN].set(params["w1"].T)
    w2t = params["w2"].T
    w3t = params["w3"].T
    b1 = params["b1"].reshape(HIDDEN, 1)
    b2 = params["b2"].reshape(HIDDEN, 1)
    b3 = params["b3"].reshape(OUT, 1)

    def const(shape):
        # Constant index_map -> block revisited every step -> stays resident
        # in VMEM for the whole grid.
        return pl.BlockSpec(shape, lambda i: (0, 0))

    idx_spec = pl.BlockSpec((1, b_tile), lambda i: (0, i))

    out_t = pl.pallas_call(
        onehotq_kernel,
        out_shape=jax.ShapeDtypeStruct((OUT, B), jnp.float32),
        grid=grid,
        in_specs=[
            idx_spec,                       # goal (1, B)
            idx_spec,                       # monster1 (1, B)
            idx_spec,                       # monster2 (1, B)
            const((HIDDEN, D_IN_PAD)),      # W1^T (zero-padded)
            const((HIDDEN, 1)),             # b1
            const((HIDDEN, HIDDEN)),        # W2^T
            const((HIDDEN, 1)),             # b2
            const((OUT, HIDDEN)),           # W3^T
            const((OUT, 1)),                # b3
        ],
        out_specs=pl.BlockSpec((OUT, b_tile), lambda i: (0, i)),
        compiler_params=pltpu.CompilerParams(
            dimension_semantics=("parallel",)),
    )(g_row, m1_row, m2_row, w1t, b1, w2t, b2, w3t, b3)

    if batch_major:
        return out_t.T                       # (B, 2) — matches the torch module
    return out_t                             # (2, B) lane-dense slab


def init_params(key):
    """Deterministic init mimicking torch.nn.Linear (U(-1/sqrt(fan_in), +))."""
    dims = [(D_IN, HIDDEN), (HIDDEN, HIDDEN), (HIDDEN, OUT)]
    params = {}
    for li, (fan_in, fan_out) in enumerate(dims, start=1):
        key, kw, kb = jax.random.split(key, 3)
        bound = 1.0 / jnp.sqrt(float(fan_in))
        params[f"w{li}"] = jax.random.uniform(
            kw, (fan_in, fan_out), jnp.float32, -bound, bound)
        params[f"b{li}"] = jax.random.uniform(
            kb, (1, fan_out), jnp.float32, -bound, bound)
    return params


def reference_forward(goal_idx, m1_idx, m2_idx, params):
    g = jax.nn.one_hot(goal_idx, GOAL_SIZE, dtype=jnp.float32)
    a = jax.nn.one_hot(m1_idx, MONSTER_SIZE, dtype=jnp.float32)
    b = jax.nn.one_hot(m2_idx, MONSTER_SIZE, dtype=jnp.float32)
    x = jnp.concatenate([g, a, b], axis=-1)
    h = jnp.maximum(x @ params["w1"] + params["b1"], 0.0)
    h = jnp.maximum(h @ params["w2"] + params["b2"], 0.0)
    return h @ params["w3"] + params["b3"]


if __name__ == "__main__":
    key = jax.random.PRNGKey(0)
    key, kp, kg, k1, k2 = jax.random.split(key, 5)

    params = init_params(kp)

    # Small deterministic example (single ragged 128-wide tile, grid of 1).
    B = 8
    goal_idx = jax.random.randint(kg, (B,), 0, GOAL_SIZE)
    m1_idx = jax.random.randint(k1, (B,), 0, MONSTER_SIZE)
    m2_idx = jax.random.randint(k2, (B,), 0, MONSTER_SIZE)

    out = one_hot_q_forward(goal_idx, m1_idx, m2_idx, params)
    out = jax.block_until_ready(out)
    ref = reference_forward(goal_idx, m1_idx, m2_idx, params)
    assert out.shape == (B, OUT)
    assert jnp.allclose(out, ref, atol=1e-5, rtol=1e-5)

    # Multi-tile grid with a ragged last block (B=300, tile=128 -> 3 steps),
    # plus the transpose-free lane-dense output path.
    key, kg2, k12, k22 = jax.random.split(key, 4)
    B2 = 300
    goal2 = jax.random.randint(kg2, (B2,), 0, GOAL_SIZE)
    m1_2 = jax.random.randint(k12, (B2,), 0, MONSTER_SIZE)
    m2_2 = jax.random.randint(k22, (B2,), 0, MONSTER_SIZE)
    out2 = jax.block_until_ready(
        one_hot_q_forward(goal2, m1_2, m2_2, params, b_tile=128,
                          batch_major=False))
    ref2 = reference_forward(goal2, m1_2, m2_2, params)
    assert out2.shape == (OUT, B2)
    assert jnp.allclose(out2.T, ref2, atol=1e-5, rtol=1e-5)

    # Larger batch exercising the default tile-size heuristic
    # (B=5000 -> b_tile=640, 8 grid steps, ragged tail).
    key, kg3, k13, k23 = jax.random.split(key, 4)
    B3 = 5000
    goal3 = jax.random.randint(kg3, (B3,), 0, GOAL_SIZE)
    m1_3 = jax.random.randint(k13, (B3,), 0, MONSTER_SIZE)
    m2_3 = jax.random.randint(k23, (B3,), 0, MONSTER_SIZE)
    out3 = jax.block_until_ready(one_hot_q_forward(goal3, m1_3, m2_3, params))
    ref3 = reference_forward(goal3, m1_3, m2_3, params)
    assert out3.shape == (B3, OUT)
    assert jnp.allclose(out3, ref3, atol=1e-5, rtol=1e-5)

    print("KERNEL_OK")
</pallas_src>

<mosaic_0001>
module attributes {stable_mosaic.version = 11 : i64} {
  func.func @onehotq_kernel(%arg0: i32, %arg1: memref<1x128xi32, #tpu.memory_space<vmem>>, %arg2: memref<1x128xi32, #tpu.memory_space<vmem>>, %arg3: memref<1x128xi32, #tpu.memory_space<vmem>>, %arg4: memref<32x32xf32, #tpu.memory_space<vmem>>, %arg5: memref<32x1xf32, #tpu.memory_space<vmem>>, %arg6: memref<32x32xf32, #tpu.memory_space<vmem>>, %arg7: memref<32x1xf32, #tpu.memory_space<vmem>>, %arg8: memref<2x32xf32, #tpu.memory_space<vmem>>, %arg9: memref<2x1xf32, #tpu.memory_space<vmem>>, %arg10: memref<2x128xf32, #tpu.memory_space<vmem>>) attributes {dimension_semantics = [#tpu.dimension_semantics<parallel>], iteration_bounds = array<i64: 1>, scalar_prefetch = 0 : i64, scratch_operands = 0 : i64, tpu.core_type = #tpu.core_type<tc>, window_params = [{transform_indices = @transform_0, window_bounds = array<i64: 1, 128>}, {transform_indices = @transform_1, window_bounds = array<i64: 1, 128>}, {transform_indices = @transform_2, window_bounds = array<i64: 1, 128>}, {pipeline_mode = #tpu.pipeline_mode<synchronous>, transform_indices = @transform_3, window_bounds = array<i64: 32, 32>}, {pipeline_mode = #tpu.pipeline_mode<synchronous>, transform_indices = @transform_4, window_bounds = array<i64: 32, 1>}, {pipeline_mode = #tpu.pipeline_mode<synchronous>, transform_indices = @transform_5, window_bounds = array<i64: 32, 32>}, {pipeline_mode = #tpu.pipeline_mode<synchronous>, transform_indices = @transform_6, window_bounds = array<i64: 32, 1>}, {pipeline_mode = #tpu.pipeline_mode<synchronous>, transform_indices = @transform_7, window_bounds = array<i64: 2, 32>}, {pipeline_mode = #tpu.pipeline_mode<synchronous>, transform_indices = @transform_8, window_bounds = array<i64: 2, 1>}, {transform_indices = @transform_9, window_bounds = array<i64: 2, 128>}]} {
    %c0 = arith.constant 0 : index
    %c0_0 = arith.constant 0 : index
    %0 = vector.load %arg1[%c0, %c0_0] : memref<1x128xi32, #tpu.memory_space<vmem>>, vector<1x128xi32>
    %c0_1 = arith.constant 0 : index
    %c0_2 = arith.constant 0 : index
    %1 = vector.load %arg2[%c0_1, %c0_2] : memref<1x128xi32, #tpu.memory_space<vmem>>, vector<1x128xi32>
    %c6_i32 = arith.constant 6 : i32
    %2 = vector.broadcast %c6_i32 : i32 to vector<1x128xi32>
    %3 = arith.addi %1, %2 : vector<1x128xi32>
    %c0_3 = arith.constant 0 : index
    %c0_4 = arith.constant 0 : index
    %4 = vector.load %arg3[%c0_3, %c0_4] : memref<1x128xi32, #tpu.memory_space<vmem>>, vector<1x128xi32>
    %c16_i32 = arith.constant 16 : i32
    %5 = vector.broadcast %c16_i32 : i32 to vector<1x128xi32>
    %6 = arith.addi %4, %5 : vector<1x128xi32>
    %7 = tpu.iota {dimensions = array<i32: 0>} : vector<32x128xi32>
    %8 = vector.broadcast %0 : vector<1x128xi32> to vector<32x128xi32>
    %9 = arith.cmpi eq, %7, %8 : vector<32x128xi32>
    %10 = vector.broadcast %3 : vector<1x128xi32> to vector<32x128xi32>
    %11 = arith.cmpi eq, %7, %10 : vector<32x128xi32>
    %12 = arith.ori %9, %11 : vector<32x128xi1>
    %13 = vector.broadcast %6 : vector<1x128xi32> to vector<32x128xi32>
    %14 = arith.cmpi eq, %7, %13 : vector<32x128xi32>
    %15 = arith.ori %12, %14 : vector<32x128xi1>
    %16 = arith.extui %15 : vector<32x128xi1> to vector<32x128xi32>
    %17 = arith.sitofp %16 : vector<32x128xi32> to vector<32x128xf32>
    %c0_5 = arith.constant 0 : index
    %c0_6 = arith.constant 0 : index
    %18 = vector.load %arg4[%c0_5, %c0_6] : memref<32x32xf32, #tpu.memory_space<vmem>>, vector<32x32xf32>
    %cst = arith.constant dense<0.000000e+00> : vector<32x128xf32>
    %19 = tpu.matmul %18, %17, %cst {dimension_numbers = #tpu.dot_dimension_numbers<[1], [0], [0], [1], [0, 0, 1, 1], [], []>} : vector<32x32xf32>, vector<32x128xf32>, vector<32x128xf32> -> vector<32x128xf32>
    %c0_7 = arith.constant 0 : index
    %c0_8 = arith.constant 0 : index
    %20 = vector.load %arg5[%c0_7, %c0_8] : memref<32x1xf32, #tpu.memory_space<vmem>>, vector<32x1xf32>
    %21 = vector.broadcast %20 : vector<32x1xf32> to vector<32x128xf32>
    %22 = arith.addf %19, %21 : vector<32x128xf32>
    %cst_9 = arith.constant 0.000000e+00 : f32
    %23 = vector.broadcast %cst_9 : f32 to vector<32x128xf32>
    %24 = arith.maximumf %22, %23 : vector<32x128xf32>
    %c0_10 = arith.constant 0 : index
    %c0_11 = arith.constant 0 : index
    %25 = vector.load %arg6[%c0_10, %c0_11] : memref<32x32xf32, #tpu.memory_space<vmem>>, vector<32x32xf32>
    %cst_12 = arith.constant dense<0.000000e+00> : vector<32x128xf32>
    %26 = tpu.matmul %25, %24, %cst_12 {dimension_numbers = #tpu.dot_dimension_numbers<[1], [0], [0], [1], [0, 0, 1, 1], [], []>} : vector<32x32xf32>, vector<32x128xf32>, vector<32x128xf32> -> vector<32x128xf32>
    %c0_13 = arith.constant 0 : index
    %c0_14 = arith.constant 0 : index
    %27 = vector.load %arg7[%c0_13, %c0_14] : memref<32x1xf32, #tpu.memory_space<vmem>>, vector<32x1xf32>
    %28 = vector.broadcast %27 : vector<32x1xf32> to vector<32x128xf32>
    %29 = arith.addf %26, %28 : vector<32x128xf32>
    %cst_15 = arith.constant 0.000000e+00 : f32
    %30 = vector.broadcast %cst_15 : f32 to vector<32x128xf32>
    %31 = arith.maximumf %29, %30 : vector<32x128xf32>
    %c0_16 = arith.constant 0 : index
    %c0_17 = arith.constant 0 : index
    %32 = vector.load %arg8[%c0_16, %c0_17] : memref<2x32xf32, #tpu.memory_space<vmem>>, vector<2x32xf32>
    %cst_18 = arith.constant dense<0.000000e+00> : vector<2x128xf32>
    %33 = tpu.matmul %32, %31, %cst_18 {dimension_numbers = #tpu.dot_dimension_numbers<[1], [0], [0], [1], [0, 0, 1, 1], [], []>} : vector<2x32xf32>, vector<32x128xf32>, vector<2x128xf32> -> vector<2x128xf32>
    %c0_19 = arith.constant 0 : index
    %c0_20 = arith.constant 0 : index
    %34 = vector.load %arg9[%c0_19, %c0_20] : memref<2x1xf32, #tpu.memory_space<vmem>>, vector<2x1xf32>
    %35 = vector.broadcast %34 : vector<2x1xf32> to vector<2x128xf32>
    %36 = arith.addf %33, %35 : vector<2x128xf32>
    %c0_21 = arith.constant 0 : index
    %c0_22 = arith.constant 0 : index
    %37 = vector.load %arg10[%c0_21, %c0_22] : memref<2x128xf32, #tpu.memory_space<vmem>>, vector<2x128xf32>
    tpu.vector_store %arg10[%c0_21, %c0_22], %36 {strides = array<i32>} : memref<2x128xf32, #tpu.memory_space<vmem>>, vector<2x128xf32>,
    return
  }
  func.func @transform_0(%arg0: i32) -> (i32, i32) {
    %c0_i32 = arith.constant 0 : i32
    %c0_i32_0 = arith.constant 0 : i32
    return %c0_i32, %arg0 : i32, i32
  }
  func.func @transform_1(%arg0: i32) -> (i32, i32) {
    %c0_i32 = arith.constant 0 : i32
    %c0_i32_0 = arith.constant 0 : i32
    return %c0_i32, %arg0 : i32, i32
  }
  func.func @transform_2(%arg0: i32) -> (i32, i32) {
    %c0_i32 = arith.constant 0 : i32
    %c0_i32_0 = arith.constant 0 : i32
    return %c0_i32, %arg0 : i32, i32
  }
  func.func @transform_3(%arg0: i32) -> (i32, i32) {
    %c0_i32 = arith.constant 0 : i32
    %c0_i32_0 = arith.constant 0 : i32
    %c0_i32_1 = arith.constant 0 : i32
    return %c0_i32, %c0_i32_0 : i32, i32
  }
  func.func @transform_4(%arg0: i32) -> (i32, i32) {
    %c0_i32 = arith.constant 0 : i32
    %c0_i32_0 = arith.constant 0 : i32
    %c0_i32_1 = arith.constant 0 : i32
    return %c0_i32, %c0_i32_0 : i32, i32
  }
  func.func @transform_5(%arg0: i32) -> (i32, i32) {
    %c0_i32 = arith.constant 0 : i32
    %c0_i32_0 = arith.constant 0 : i32
    %c0_i32_1 = arith.constant 0 : i32
    return %c0_i32, %c0_i32_0 : i32, i32
  }
  func.func @transform_6(%arg0: i32) -> (i32, i32) {
    %c0_i32 = arith.constant 0 : i32
    %c0_i32_0 = arith.constant 0 : i32
    %c0_i32_1 = arith.constant 0 : i32
    return %c0_i32, %c0_i32_0 : i32, i32
  }
  func.func @transform_7(%arg0: i32) -> (i32, i32) {
    %c0_i32 = arith.constant 0 : i32
    %c0_i32_0 = arith.constant 0 : i32
    %c0_i32_1 = arith.constant 0 : i32
    return %c0_i32, %c0_i32_0 : i32, i32
  }
  func.func @transform_8(%arg0: i32) -> (i32, i32) {
    %c0_i32 = arith.constant 0 : i32
    %c0_i32_0 = arith.constant 0 : i32
    %c0_i32_1 = arith.constant 0 : i32
    return %c0_i32, %c0_i32_0 : i32, i32
  }
  func.func @transform_9(%arg0: i32) -> (i32, i32) {
    %c0_i32 = arith.constant 0 : i32
    %c0_i32_0 = arith.constant 0 : i32
    return %c0_i32, %arg0 : i32, i32
  }
}

</mosaic_0001>

<bundles_post_ra>
// kernel: one_hot_q_forward.1
= control target key start
LH: loop header
LB: loop body
LE: loop exit
PB: predicated region body
PF: predicated region fallthrough
CT: control target
= control target key end

     0   :  { %v38_v2 = vlaneseq  ;;  %vm111_vm0 = vcmask 261120   ;;  %v569_v8 = vmov 0   ;;  %s715_s0 = inlined_call_operand.vmem [shape: s32[1,8], index: 0, kind: input, shape index: {}]   ;;  %s716_s1 = inlined_call_operand.vmem [shape: s32[1,8], index: 1, kind: input, shape index: {}]   ;;  %s717_s2 = inlined_call_operand.vmem [shape: s32[1,8], index: 2, kind: input, shape index: {}]   ;;  %s718_s3 = inlined_call_operand.vmem [shape: f32[32,32], index: 3, kind: input, shape index: {}]   ;;  %s719_s4 = inlined_call_operand.vmem [shape: f32[32,1], index: 4, kind: input, shape index: {}]   ;;  %s720_s5 = inlined_call_operand.vmem [shape: f32[32,32], index: 5, kind: input, shape index: {}]   ;;  %s721_s6 = inlined_call_operand.vmem [shape: f32[32,1], index: 6, kind: input, shape index: {}]   ;;  %s722_s7 = inlined_call_operand.vmem [shape: f32[2,32], index: 7, kind: input, shape index: {}]   ;;  %s723_s8 = inlined_call_operand.vmem [shape: f32[2,1], index: 8, kind: input, shape index: {}]   ;;  %s724_s9 = inlined_call_operand.hbm [shape: f32[2,8], index: 9, kind: output, shape index: {}]  }
   0x1   :  { %v34_v0 = vld [vmem:[%s716_s1] sm:$0x1]  ;;  %543 = vset.pattern.permute.xlu0 %v569_v8  ;;  %544 = vset.pattern.permute.xlu1 %v569_v8  ;;  %v89_v10 = vld [vmem:[%s719_s4 + $0x10] sm:$0xff]  ;;  %v88_v13 = vld [vmem:[%s719_s4 + $0x8] sm:$0xff] }
   0x2   :  { %v36_v1 = vld [vmem:[%s717_s2] sm:$0x1]  ;;  %v35_v4 = vadd.s32 6, %v34_v0  ;;  %v39_v6 = vshrl.u32 %v38_v2, 7  ;;  %103 = vperm.xlu1 %544, %v89_v10   ;;  %v90_v16 = vld [vmem:[%s719_s4 + $0x18] sm:$0xff] }
   0x3   :  { %v83_v3 = vld [vmem:[%s718_s3] sm:$0xff]  ;;  %v37_v5 = vadd.s32 16, %v36_v1 }
   0x4   :  { %484 = vmatprep.mubr.msk.f32.mxu0 %vm111_vm0, %v83_v3  ;;  %v437_v7 = vld [vmem:[%s715_s0] ss:$0 sm:$0xff]  ;;  %v40_v11 = vadd.s32 8, %v39_v6  ;;  %v53_v12 = vsub.s32 0, %v39_v6 }
   0x5   :  { %v87_v9 = vld [vmem:[%s719_s4] sm:$0xff]  ;;  %vm47_vm1 = vcmp.eq.s32.totalorder %v39_v6, %v437_v7 }
   0x6   :  { %93 = vperm.xlu0 %543, %v87_v9   ;;  %v54_v14 = vrot.slane %v35_v4, %v53_v12  ;;  %v66_v15 = vrot.slane %v37_v5, %v53_v12 }
   0x7   :  { %14 = vsyncpa [#allocation3], 0  ;;  %vm48_vm2 = vcmp.eq.s32.totalorder %v40_v11, %v437_v7  ;;  %v41_v17 = vadd.s32 16, %v39_v6  ;;  %v42_v18 = vadd.s32 24, %v39_v6  ;;  %v217_v19 = vld [vmem:[%s721_s6] sm:$0xff]  ;;  %108 = vperm.xlu1 %544, %v90_v16   ;;  %v218_v20 = vld [vmem:[%s721_s6 + $0x8] sm:$0xff] }
   0x8   :  { %vm55_vm3 = vcmp.eq.s32.totalorder %v39_v6, %v54_v14  ;;  %vm56_vm4 = vcmp.eq.s32.totalorder %v40_v11, %v54_v14  ;;  %vm67_vm5 = vcmp.eq.s32.totalorder %v39_v6, %v66_v15  ;;  %vm68_vm7 = vcmp.eq.s32.totalorder %v40_v11, %v66_v15  ;;  %v219_v22 = vld [vmem:[%s721_s6 + $0x10] sm:$0xff]  ;;  %v220_v24 = vld [vmem:[%s721_s6 + $0x18] sm:$0xff]  ;;  %v343_v25 = vld [vmem:[%s723_s8] sm:$0x3]  ;;  %s574_s20 = smov [#allocation2]  }
   0x9   :  { %vm59_vm6 = vmor %vm47_vm1, %vm55_vm3  ;;  %vm49_vm10 = vcmp.eq.s32.totalorder %v41_v17, %v437_v7  ;;  %vm57_vm11 = vcmp.eq.s32.totalorder %v41_v17, %v54_v14  ;;  %vm50_vm13 = vcmp.eq.s32.totalorder %v42_v18, %v437_v7  ;;  %vm58_vm14 = vcmp.eq.s32.totalorder %v42_v18, %v54_v14  ;;  %v84_v26 = vld [vmem:[%s718_s3 + $0x8] sm:$0xff]  ;;  %v85_v27 = vld [vmem:[%s718_s3 + $0x10] sm:$0xff]  ;;  %s429_s0 = sshll.u32 %s574_s20, 4  ;;  %s430_s0 = int_to_ptr.vmem [resolvable:$true] %s429_s0 }
   0xa   :  { %98 = vperm.xlu0 %543, %v88_v13   ;;  %vm60_vm8 = vmor %vm48_vm2, %vm56_vm4  ;;  %vm69_vm1 = vcmp.eq.s32.totalorder %v41_v17, %v66_v15  ;;  %v570_v23 = vmov 1.0|1.0   ;;  %vm70_vm3 = vcmp.eq.s32.totalorder %v42_v18, %v66_v15  ;;  %v86_v28 = vld [vmem:[%s718_s3 + $0x18] sm:$0xff]  ;;  %v213_v29 = vld [vmem:[%s720_s5] sm:$0xff]  ;;  %v571_v51 = vmov 0.0|0.0   ;;  %s545_s21 = scalar_lea.vmem %s430_s0, 32  ;;  %p550_p1 = scmp.lt.s32.totalorder %s430_s0, %s430_s0 }
   0xb   :  { %vm656_vm9 = vmor %vm59_vm6, %vm67_vm5  ;;  %228 = vperm.xlu1 %544, %v218_v20   ;;  %498 = vmatprep.mubr.msk.f32.mxu1 %vm111_vm0, %v213_v29  ;;  %v214_v48 = vld [vmem:[%s720_s5 + $0x8] sm:$0xff]  ;;  %v215_v49 = vld [vmem:[%s720_s5 + $0x10] sm:$0xff]  ;;  %v573_v52 = vmov 0.0   ;;  %p546_p0 = scmp.ne.s32.totalorder %s430_s0, %s545_s21  ;;  %p551_p2 = scmp.lt.s32.totalorder %s545_s21, %s545_s21 }
   0xc   :  { %vm72_vm12 = vmor %vm60_vm8, %vm68_vm7  ;;  %v216_v50 = vld [vmem:[%s720_s5 + $0x18] sm:$0xff]  ;;  %vm572_vm8 = vmmov 0   ;;  %v342_v7 = vld [vmem:[%s722_s7] sm:$0x3] }
   0xd   :  { %vm515_vm15 = vmpackc.low %vm72_vm12, %vm656_vm9  ;;  %p552_p3 = por %p551_p2, %p550_p1 }
   0xe   :  { %223 = vperm.xlu0 %543, %v217_v19   ;;  %516 = vmatprep.subr.msk.bf16.mxu0 %vm515_vm15, %v570_v23  ;;  %vm61_vm2 = vmor %vm49_vm10, %vm57_vm11 }
   0xf   :  { %518 = vmatpush3.bf16.msk.msra.mxu0 %vm515_vm15, %v570_v23  ;;  %vm62_vm4 = vmor %vm50_vm13, %vm58_vm14  ;;  %238 = vperm.xlu1 %544, %v220_v24   ;;  %p553_p4 = pnand %p552_p3, %p546_p0 }
  0x10   :  { %vm73_vm5 = vmor %vm61_vm2, %vm69_vm1 }
  0x11   :  { %vm74_vm6 = vmor %vm62_vm4, %vm70_vm3 }
  0x12   :  { %233 = vperm.xlu0 %543, %v219_v22   ;;  %vm519_vm7 = vmpackc.low %vm74_vm6, %vm73_vm5 }
  0x13   :  { %520 = vmatprep.subr.msk.bf16.mxu0 %vm519_vm7, %v570_v23 }
  0x14   :  { %522 = vmatpush3.bf16.msk.msra.mxu0 %vm519_vm7, %v570_v23 }
  0x15   :  { %531 = vmatprep.subr.bf16.mxu0 %v571_v51 }
  0x16   :  { %346 = vperm.xlu0 %543, %v343_v25  }
  0x17   :  { %485 = vmatmul.mubr.msk.f32.vlgmr.msra.gmra.mrb[0].mxu0 %vm111_vm0, %v84_v26 }
  0x18   :  { %487 = vmatprep.mubr.msk.f32.mxu0 %vm111_vm0, %v85_v27 }
  0x1b   :  { %488 = vmatmul.mubr.msk.f32.gmra.mrb[2].mxu0 %vm111_vm0, %v86_v28 }
  0x1c   :  { %512 = vmatprep.mubr.msk.f32.mxu0 %vm572_vm8, %v573_v52 }
  0x81   :  { %v104_v31 = vpop.permute.xlu1 %103 }
  0x85   :  { %v94_v30 = vpop.permute.xlu0 %93 }
  0x86   :  { %v109_v38 = vpop.permute.xlu1 %108 }
  0x89   :  { %v99_v32 = vpop.permute.xlu0 %98 }
  0x8a   :  { %v229_v53 = vpop.permute.xlu1 %228 }
  0x8d   :  { %v224_v54 = vpop.permute.xlu0 %223 }
  0x8e   :  { %v239_v60 = vpop.permute.xlu1 %238 }
  0x91   :  { %v234_v63 = vpop.permute.xlu0 %233 }
  0x95   :  { %v347_v8 = vpop.permute.xlu0 %346 }
  0xea   :  { %v486_v33 = vpop.f32.mrb[0].mxu0 }
  0xeb   :  { %v196_v34 = vadd.f32 %v486_v33, %v99_v32  ;;  %v190_v35 = vpop.f32.mrb[1].mxu0 }
  0xec   :  { %v191_v36 = vadd.f32 %v190_v35, %v94_v30 }
  0xed   :  { %v210_v37 = vmax.f32 %v196_v34, 0.0 }
  0xee   :  { %v209_v39 = vmax.f32 %v191_v36, 0.0  ;;  %v489_v40 = vpop.f32.mrb[2].mxu0 }
  0xef   :  { %v206_v41 = vadd.f32 %v489_v40, %v109_v38  ;;  %v200_v42 = vpop.f32.mrb[3].mxu0 }
  0xf0   :  { %v201_v43 = vadd.f32 %v200_v42, %v104_v31  ;;  %v523_v44 = vpack.c.bf16 %v210_v37, %v209_v39 }
  0xf1   :  { %v212_v45 = vmax.f32 %v206_v41, 0.0 }
  0xf2   :  { %v211_v46 = vmax.f32 %v201_v43, 0.0  ;;  %524 = vmatprep.subr.bf16.mxu1 %v523_v44 }
  0xf3   :  { %526 = vmatpush3.bf16.msra.mxu1 %v523_v44 }
  0xf4   :  { %v527_v47 = vpack.c.bf16 %v212_v45, %v211_v46 }
  0xf6   :  { %528 = vmatprep.subr.bf16.mxu1 %v527_v47 }
  0xf7   :  { %530 = vmatpush3.bf16.msra.mxu1 %v527_v47 }
  0xfa   :  { %499 = vmatmul.mubr.msk.f32.vlgmr.msra.gmra.mrb[0].mxu1 %vm111_vm0, %v214_v48 }
  0xfb   :  { %501 = vmatprep.mubr.msk.f32.mxu1 %vm111_vm0, %v215_v49 }
  0xfe   :  { %502 = vmatmul.mubr.msk.f32.gmra.mrb[2].mxu1 %vm111_vm0, %v216_v50 }
 0x1cd   :  { %v500_v55 = vpop.f32.mrb[0].mxu1 }
 0x1ce   :  { %v325_v56 = vadd.f32 %v500_v55, %v229_v53  ;;  %v319_v57 = vpop.f32.mrb[1].mxu1 }
 0x1cf   :  { %v320_v58 = vadd.f32 %v319_v57, %v224_v54 }
 0x1d0   :  { %v339_v59 = vmax.f32 %v325_v56, 0.0 }
 0x1d1   :  { %v338_v61 = vmax.f32 %v320_v58, 0.0  ;;  %v503_v62 = vpop.f32.mrb[2].mxu1 }
 0x1d2   :  { %v335_v0 = vadd.f32 %v503_v62, %v239_v60  ;;  %v329_v1 = vpop.f32.mrb[3].mxu1 }
 0x1d3   :  { %v532_v2 = vpack.c.bf16 %v339_v59, %v338_v61  ;;  %v330_v3 = vadd.f32 %v329_v1, %v234_v63 }
 0x1d4   :  { %v341_v4 = vmax.f32 %v335_v0, 0.0 }
 0x1d5   :  { %v340_v5 = vmax.f32 %v330_v3, 0.0  ;;  %533 = vmatpush3.bf16.msra.mxu0 %v532_v2 }
 0x1d6   :  { %534 = vmatprep.subr.bf16.mxu0 %v571_v51 }
 0x1d7   :  { %v535_v6 = vpack.c.bf16 %v341_v4, %v340_v5 }
 0x1d9   :  { %536 = vmatpush3.bf16.msra.mxu0 %v535_v6 }
 0x1dc   :  { %513 = vmatmul.mubr.msk.f32.vlgmr.msra.gmra.mrb[4].mxu0 %vm111_vm0, %v342_v7 }
 0x2af   :  { %v418_v9 = vpop.f32.mrb[4].mxu0 }
 0x2b0   :  { %v419_v10 = vadd.f32 %v418_v9, %v347_v8  ;;  %v514_v11 = vpop.f32.mrb[5].mxu0 }
 0x2b2   :  { %422 = vst [vmem:[#allocation2] sm:$0x3] %v419_v10 }
 0x2b3   :  { %556 = shalt.err (!%p553_p4)
}
 0x2b4   :  { %s557_s7 = scalar_lea.hbm %s724_s9, 32 }
 0x2b5   :  { %p558_p5 = scmp.ne.s32.totalorder %s724_s9, %s557_s7  ;;  %p561_p6 = scmp.lt.u32.totalorder %s557_s7, %s724_s9 }
 0x2b7   :  { %p563_p7 = pnand %p561_p6, %p558_p5 }
 0x2b9   :  { %566 = shalt.err (!%p563_p7)
}
 0x2ba   :  { %432 = dma.vmem_to_hbm [thread:$0]  %s430_s0, 32, %s724_s9, [#allocation3]  }
 0x2bb   :  { %567 = dma.done.wait [#allocation3], 32  }
 0x2bc   :  { %568 = vsyncadd [#allocation3], 4294967264 }
 0x2bd   :  { %436 = vsyncpa [#allocation3], 1 }

</bundles_post_ra>
